<compile_context>
chip_gen: v5e
topology: v5e:2x2
jax: 0.10.0
libtpu: 0.0.40
codegen_flags: <defaults>
</compile_context>

<pallas_src>
import functools

import jax
import jax.numpy as jnp
from jax import lax
from jax.experimental import pallas as pl
from jax.experimental.pallas import tpu as pltpu


LANE = 128  # pad MLP feature dims / v feature dim to the 128-lane vreg width


# ----------------------------------------------------------------------------
# Fused Pallas kernel: rep_k MLP + rep_q MLP + scaled-dot-product attention
# ----------------------------------------------------------------------------
def _fused_attention_kernel(
    k_ref, q_ref, v_ref,
    wk0_ref, bk0_ref, wk1_ref, bk1_ref, wk2_ref, bk2_ref,
    wq0_ref, bq0_ref, wq1_ref, bq1_ref, wq2_ref, bq2_ref,
    o_ref, *, batch, n_k, n_q):
    """Single invocation: both batches processed in one pass."""

    def mlp(x, w0, b0, w1, b1, w2, b2):
        # Dense -> ReLU -> Dense -> ReLU -> Dense.
        # bf16 operands into the MXU, f32 accumulation; elementwise stays f32.
        h = jnp.dot(x.astype(jnp.bfloat16), w0[...],
                    preferred_element_type=jnp.float32)
        h = jnp.maximum(h + b0[...].astype(jnp.float32), 0.0)
        h = jnp.dot(h.astype(jnp.bfloat16), w1[...],
                    preferred_element_type=jnp.float32)
        h = jnp.maximum(h + b1[...].astype(jnp.float32), 0.0)
        h = jnp.dot(h.astype(jnp.bfloat16), w2[...],
                    preferred_element_type=jnp.float32)
        return h + b2[...].astype(jnp.float32)

    # Batch folded into rows -> each MLP matmul runs once for all batches.
    kk = mlp(k_ref[...], wk0_ref, bk0_ref, wk1_ref, bk1_ref, wk2_ref, bk2_ref)  # [B*n_k, LANE] f32
    qq = mlp(q_ref[...], wq0_ref, bq0_ref, wq1_ref, bq1_ref, wq2_ref, bq2_ref)  # [B*n_q, LANE] f32
    # NOTE: 1/sqrt(kq_size) is already folded into wq2/bq2.

    # Statically unrolled batch loop (B is tiny); slices are 8-row aligned.
    for b in range(batch):
        kb = kk[b * n_k:(b + 1) * n_k].astype(jnp.bfloat16)   # [n_k, LANE]
        qb = qq[b * n_q:(b + 1) * n_q].astype(jnp.bfloat16)   # [n_q, LANE]

        # QK^T: contract the last dims directly (no transposed copy of k).
        s = lax.dot_general(
            qb, kb, dimension_numbers=(((1,), (1,)), ((), ())),
            preferred_element_type=jnp.float32)                # [n_q, n_k] f32

        # Softmax in f32 (v5e-safe); approx reciprocal goes to the EUP slot.
        m = jnp.max(s, axis=-1, keepdims=True)
        p = jnp.exp(s - m)
        denom = jnp.sum(p, axis=-1, keepdims=True)
        p = p * pl.reciprocal(denom, approx=True)

        # PV matmul: bf16 MXU inputs, f32 accumulation; lane-dense store.
        o = jnp.dot(p.astype(jnp.bfloat16), v_ref[b].astype(jnp.bfloat16),
                    preferred_element_type=jnp.float32)        # [n_q, LANE]
        o_ref[b] = o.astype(o_ref.dtype)


@jax.jit
def attention_forward(k, q, v, rep_k_params, rep_q_params):
    """Attention.forward with rep='mlp', attention_type='dot' (eval mode).

    `rep_*_params` must be the prepared (lane-padded, bf16, scale-folded)
    parameters from `prepare_mlp_params`.
    """
    B, n_k, x_size = k.shape
    _, n_q, _ = q.shape
    dv = v.shape[-1]

    (wk0, bk0), (wk1, bk1), (wk2, bk2) = rep_k_params
    (wq0, bq0), (wq1, bq1), (wq2, bq2) = rep_q_params

    # Fold batch into the MLP row dimension (contiguous reshape -> free).
    k2 = k.reshape(B * n_k, x_size)
    q2 = q.reshape(B * n_q, x_size)
    # Pad v's feature dim to 128 lanes -> lane-dense output stores.
    v_pad = jnp.pad(v, ((0, 0), (0, 0), (0, LANE - dv))) if dv < LANE else v

    n_inputs = 15
    out = pl.pallas_call(
        functools.partial(_fused_attention_kernel, batch=B, n_k=n_k, n_q=n_q),
        out_shape=jax.ShapeDtypeStruct((B, n_q, LANE), jnp.float32),
        in_specs=[pl.BlockSpec(memory_space=pltpu.MemorySpace.VMEM)] * n_inputs,
        out_specs=pl.BlockSpec(memory_space=pltpu.MemorySpace.VMEM),
    )(k2, q2, v_pad,
      wk0, bk0, wk1, bk1, wk2, bk2,
      wq0, bq0, wq1, bq1, wq2, bq2)

    return out[..., :dv]


# ----------------------------------------------------------------------------
# Parameter init + one-time kernel-friendly preparation
# ----------------------------------------------------------------------------
def init_mlp_params(key, x_size, out_size, hidden_size, n_hidden_layers):
    """Raw f32 params: Linear(x,h) -> ReLU -> [Linear(h,h) -> ReLU]* -> Linear(h,out)."""
    dims = [x_size] + [hidden_size] * n_hidden_layers + [out_size]
    params = []
    for i in range(len(dims) - 1):
        key, kw, kb = jax.random.split(key, 3)
        din, dout = dims[i], dims[i + 1]
        w = jax.random.normal(kw, (din, dout), jnp.float32) / jnp.sqrt(
            jnp.float32(din))
        b = 0.01 * jax.random.normal(kb, (dout,), jnp.float32)
        params.append((w, b))
    return params


def prepare_mlp_params(params, *, pad_to=LANE, out_scale=1.0,
                       dtype=jnp.bfloat16):
    """One-time prep: zero-pad feature dims to the lane width (math identical),
    fold `out_scale` into the last layer, cast to bf16 for halved HBM/VMEM."""
    prepped = []
    n = len(params)
    for i, (w, b) in enumerate(params):
        din, dout = w.shape
        if i == n - 1 and out_scale != 1.0:
            w = w * out_scale
            b = b * out_scale
        din_p = din if i == 0 else pad_to    # first layer keeps raw x_size rows
        wp = jnp.zeros((din_p, pad_to), jnp.float32).at[:din, :dout].set(w)
        bp = jnp.zeros((1, pad_to), jnp.float32).at[:, :dout].set(b)
        prepped.append((wp.astype(dtype), bp.astype(dtype)))
    return prepped


# ----------------------------------------------------------------------------
# Pure-JAX references (for correctness checks)
# ----------------------------------------------------------------------------
def _mlp_matched(x, params):
    """Mirror the kernel's precision policy (bf16 at the MXU, f32 elsewhere)."""
    h = x
    n = len(params)
    for i, (w, b) in enumerate(params):
        h = jnp.dot(h.astype(jnp.bfloat16), w,
                    preferred_element_type=jnp.float32) + b.astype(jnp.float32)
        if i < n - 1:
            h = jnp.maximum(h, 0.0)
    return h


def reference_matched(k, q, v, pk_prep, pq_prep):
    """Same math as the kernel (padded bf16 weights, bf16-at-MXU, scale folded)."""
    B, n_k, x_size = k.shape
    _, n_q, _ = q.shape
    kk = _mlp_matched(k.reshape(B * n_k, x_size), pk_prep)
    qq = _mlp_matched(q.reshape(B * n_q, x_size), pq_prep)
    kk = kk.astype(jnp.bfloat16).reshape(B, n_k, -1)
    qq = qq.astype(jnp.bfloat16).reshape(B, n_q, -1)
    s = jnp.einsum("bqd,bkd->bqk", qq, kk, preferred_element_type=jnp.float32)
    p = jax.nn.softmax(s, axis=-1)
    return jnp.einsum("bqk,bkd->bqd", p.astype(jnp.bfloat16),
                      v.astype(jnp.bfloat16),
                      preferred_element_type=jnp.float32)


def reference_f32(k, q, v, pk_raw, pq_raw, kq_size):
    """Full-f32 reference on the raw (unpadded, unscaled) parameters."""
    def mlp(x, params):
        h = x
        for i, (w, b) in enumerate(params):
            h = h @ w + b
            if i < len(params) - 1:
                h = jnp.maximum(h, 0.0)
        return h
    kk = mlp(k, pk_raw)
    qq = mlp(q, pq_raw)
    s = jnp.einsum("bqd,bkd->bqk", qq, kk) / jnp.sqrt(jnp.float32(kq_size))
    p = jax.nn.softmax(s, axis=-1)
    return jnp.einsum("bqk,bkd->bqd", p, v)


# ----------------------------------------------------------------------------
if __name__ == "__main__":
    # Config matches Attention(kq_size=32, v_size=32, out_size=32, x_size=4,
    #                          attention_type='dot', rep='mlp', attention_layers=2)
    B, n_k, n_q = 2, 16, 8
    x_size, kq_size, v_size = 4, 32, 32
    attention_layers = 2

    root = jax.random.PRNGKey(0)
    k_key, q_key, v_key, pk_key, pq_key = jax.random.split(root, 5)

    k_in = jax.random.normal(k_key, (B, n_k, x_size), jnp.float32)
    q_in = jax.random.normal(q_key, (B, n_q, x_size), jnp.float32)
    v_in = jax.random.normal(v_key, (B, n_k, v_size), jnp.float32)

    pk_raw = init_mlp_params(pk_key, x_size, kq_size, kq_size, attention_layers)
    pq_raw = init_mlp_params(pq_key, x_size, kq_size, kq_size, attention_layers)

    # One-time prep: pad to 128 lanes, bf16, fold 1/sqrt(kq_size) into rep_q's
    # last layer.
    scale = 1.0 / float(kq_size) ** 0.5
    pk_prep = prepare_mlp_params(pk_raw)
    pq_prep = prepare_mlp_params(pq_raw, out_scale=scale)

    out = attention_forward(k_in, q_in, v_in, pk_prep, pq_prep)
    out = jax.block_until_ready(out)
    assert out.shape == (B, n_q, v_size), out.shape

    # Tight check vs a reference with the kernel's exact precision policy.
    ref_m = reference_matched(k_in, q_in, v_in, pk_prep, pq_prep)
    err_m = float(jnp.max(jnp.abs(out - ref_m)))
    assert jnp.allclose(out, ref_m, atol=1e-2, rtol=1e-2), err_m

    # Semantics check vs the full-f32 reference (tolerance covers bf16 storage
    # of weights + bf16 MXU operands).
    ref_f = reference_f32(k_in, q_in, v_in, pk_raw, pq_raw, kq_size)
    err_f = float(jnp.max(jnp.abs(out - ref_f)))
    assert jnp.allclose(out, ref_f, atol=6e-2, rtol=6e-2), err_f

    print("KERNEL_OK")
</pallas_src>

<mosaic_0001>
module attributes {stable_mosaic.version = 11 : i64} {
  func.func @_fused_attention_kernel(%arg0: memref<32x4xf32, #tpu.memory_space<vmem>>, %arg1: memref<16x4xf32, #tpu.memory_space<vmem>>, %arg2: memref<2x16x128xf32, #tpu.memory_space<vmem>>, %arg3: memref<4x128xbf16, #tpu.memory_space<vmem>>, %arg4: memref<1x128xbf16, #tpu.memory_space<vmem>>, %arg5: memref<128x128xbf16, #tpu.memory_space<vmem>>, %arg6: memref<1x128xbf16, #tpu.memory_space<vmem>>, %arg7: memref<128x128xbf16, #tpu.memory_space<vmem>>, %arg8: memref<1x128xbf16, #tpu.memory_space<vmem>>, %arg9: memref<4x128xbf16, #tpu.memory_space<vmem>>, %arg10: memref<1x128xbf16, #tpu.memory_space<vmem>>, %arg11: memref<128x128xbf16, #tpu.memory_space<vmem>>, %arg12: memref<1x128xbf16, #tpu.memory_space<vmem>>, %arg13: memref<128x128xbf16, #tpu.memory_space<vmem>>, %arg14: memref<1x128xbf16, #tpu.memory_space<vmem>>, %arg15: memref<2x8x128xf32, #tpu.memory_space<vmem>>) attributes {dimension_semantics = [], scalar_prefetch = 0 : i64, scratch_operands = 0 : i64, tpu.core_type = #tpu.core_type<tc>} {
    %c0 = arith.constant 0 : index
    %c0_0 = arith.constant 0 : index
    %0 = vector.load %arg0[%c0, %c0_0] : memref<32x4xf32, #tpu.memory_space<vmem>>, vector<32x4xf32>
    %1 = arith.truncf %0 : vector<32x4xf32> to vector<32x4xbf16>
    %c0_1 = arith.constant 0 : index
    %c0_2 = arith.constant 0 : index
    %2 = vector.load %arg3[%c0_1, %c0_2] : memref<4x128xbf16, #tpu.memory_space<vmem>>, vector<4x128xbf16>
    %cst = arith.constant dense<0.000000e+00> : vector<32x128xf32>
    %3 = tpu.matmul %1, %2, %cst {dimension_numbers = #tpu.dot_dimension_numbers<[1], [0], [0], [1], [0, 0, 1, 1], [], []>} : vector<32x4xbf16>, vector<4x128xbf16>, vector<32x128xf32> -> vector<32x128xf32>
    %c0_3 = arith.constant 0 : index
    %c0_4 = arith.constant 0 : index
    %4 = vector.load %arg4[%c0_3, %c0_4] : memref<1x128xbf16, #tpu.memory_space<vmem>>, vector<1x128xbf16>
    %5 = arith.extf %4 : vector<1x128xbf16> to vector<1x128xf32>
    %6 = vector.broadcast %5 : vector<1x128xf32> to vector<32x128xf32>
    %7 = arith.addf %3, %6 : vector<32x128xf32>
    %cst_5 = arith.constant 0.000000e+00 : f32
    %8 = vector.broadcast %cst_5 : f32 to vector<32x128xf32>
    %9 = arith.maximumf %7, %8 : vector<32x128xf32>
    %10 = arith.truncf %9 : vector<32x128xf32> to vector<32x128xbf16>
    %c0_6 = arith.constant 0 : index
    %c0_7 = arith.constant 0 : index
    %11 = vector.load %arg5[%c0_6, %c0_7] : memref<128x128xbf16, #tpu.memory_space<vmem>>, vector<128x128xbf16>
    %cst_8 = arith.constant dense<0.000000e+00> : vector<32x128xf32>
    %12 = tpu.matmul %10, %11, %cst_8 {dimension_numbers = #tpu.dot_dimension_numbers<[1], [0], [0], [1], [0, 0, 1, 1], [], []>} : vector<32x128xbf16>, vector<128x128xbf16>, vector<32x128xf32> -> vector<32x128xf32>
    %c0_9 = arith.constant 0 : index
    %c0_10 = arith.constant 0 : index
    %13 = vector.load %arg6[%c0_9, %c0_10] : memref<1x128xbf16, #tpu.memory_space<vmem>>, vector<1x128xbf16>
    %14 = arith.extf %13 : vector<1x128xbf16> to vector<1x128xf32>
    %15 = vector.broadcast %14 : vector<1x128xf32> to vector<32x128xf32>
    %16 = arith.addf %12, %15 : vector<32x128xf32>
    %cst_11 = arith.constant 0.000000e+00 : f32
    %17 = vector.broadcast %cst_11 : f32 to vector<32x128xf32>
    %18 = arith.maximumf %16, %17 : vector<32x128xf32>
    %19 = arith.truncf %18 : vector<32x128xf32> to vector<32x128xbf16>
    %c0_12 = arith.constant 0 : index
    %c0_13 = arith.constant 0 : index
    %20 = vector.load %arg7[%c0_12, %c0_13] : memref<128x128xbf16, #tpu.memory_space<vmem>>, vector<128x128xbf16>
    %cst_14 = arith.constant dense<0.000000e+00> : vector<32x128xf32>
    %21 = tpu.matmul %19, %20, %cst_14 {dimension_numbers = #tpu.dot_dimension_numbers<[1], [0], [0], [1], [0, 0, 1, 1], [], []>} : vector<32x128xbf16>, vector<128x128xbf16>, vector<32x128xf32> -> vector<32x128xf32>
    %c0_15 = arith.constant 0 : index
    %c0_16 = arith.constant 0 : index
    %22 = vector.load %arg8[%c0_15, %c0_16] : memref<1x128xbf16, #tpu.memory_space<vmem>>, vector<1x128xbf16>
    %23 = arith.extf %22 : vector<1x128xbf16> to vector<1x128xf32>
    %24 = vector.broadcast %23 : vector<1x128xf32> to vector<32x128xf32>
    %25 = arith.addf %21, %24 : vector<32x128xf32>
    %c0_17 = arith.constant 0 : index
    %c0_18 = arith.constant 0 : index
    %26 = vector.load %arg1[%c0_17, %c0_18] : memref<16x4xf32, #tpu.memory_space<vmem>>, vector<16x4xf32>
    %27 = arith.truncf %26 : vector<16x4xf32> to vector<16x4xbf16>
    %c0_19 = arith.constant 0 : index
    %c0_20 = arith.constant 0 : index
    %28 = vector.load %arg9[%c0_19, %c0_20] : memref<4x128xbf16, #tpu.memory_space<vmem>>, vector<4x128xbf16>
    %cst_21 = arith.constant dense<0.000000e+00> : vector<16x128xf32>
    %29 = tpu.matmul %27, %28, %cst_21 {dimension_numbers = #tpu.dot_dimension_numbers<[1], [0], [0], [1], [0, 0, 1, 1], [], []>} : vector<16x4xbf16>, vector<4x128xbf16>, vector<16x128xf32> -> vector<16x128xf32>
    %c0_22 = arith.constant 0 : index
    %c0_23 = arith.constant 0 : index
    %30 = vector.load %arg10[%c0_22, %c0_23] : memref<1x128xbf16, #tpu.memory_space<vmem>>, vector<1x128xbf16>
    %31 = arith.extf %30 : vector<1x128xbf16> to vector<1x128xf32>
    %32 = vector.broadcast %31 : vector<1x128xf32> to vector<16x128xf32>
    %33 = arith.addf %29, %32 : vector<16x128xf32>
    %cst_24 = arith.constant 0.000000e+00 : f32
    %34 = vector.broadcast %cst_24 : f32 to vector<16x128xf32>
    %35 = arith.maximumf %33, %34 : vector<16x128xf32>
    %36 = arith.truncf %35 : vector<16x128xf32> to vector<16x128xbf16>
    %c0_25 = arith.constant 0 : index
    %c0_26 = arith.constant 0 : index
    %37 = vector.load %arg11[%c0_25, %c0_26] : memref<128x128xbf16, #tpu.memory_space<vmem>>, vector<128x128xbf16>
    %cst_27 = arith.constant dense<0.000000e+00> : vector<16x128xf32>
    %38 = tpu.matmul %36, %37, %cst_27 {dimension_numbers = #tpu.dot_dimension_numbers<[1], [0], [0], [1], [0, 0, 1, 1], [], []>} : vector<16x128xbf16>, vector<128x128xbf16>, vector<16x128xf32> -> vector<16x128xf32>
    %c0_28 = arith.constant 0 : index
    %c0_29 = arith.constant 0 : index
    %39 = vector.load %arg12[%c0_28, %c0_29] : memref<1x128xbf16, #tpu.memory_space<vmem>>, vector<1x128xbf16>
    %40 = arith.extf %39 : vector<1x128xbf16> to vector<1x128xf32>
    %41 = vector.broadcast %40 : vector<1x128xf32> to vector<16x128xf32>
    %42 = arith.addf %38, %41 : vector<16x128xf32>
    %cst_30 = arith.constant 0.000000e+00 : f32
    %43 = vector.broadcast %cst_30 : f32 to vector<16x128xf32>
    %44 = arith.maximumf %42, %43 : vector<16x128xf32>
    %45 = arith.truncf %44 : vector<16x128xf32> to vector<16x128xbf16>
    %c0_31 = arith.constant 0 : index
    %c0_32 = arith.constant 0 : index
    %46 = vector.load %arg13[%c0_31, %c0_32] : memref<128x128xbf16, #tpu.memory_space<vmem>>, vector<128x128xbf16>
    %cst_33 = arith.constant dense<0.000000e+00> : vector<16x128xf32>
    %47 = tpu.matmul %45, %46, %cst_33 {dimension_numbers = #tpu.dot_dimension_numbers<[1], [0], [0], [1], [0, 0, 1, 1], [], []>} : vector<16x128xbf16>, vector<128x128xbf16>, vector<16x128xf32> -> vector<16x128xf32>
    %c0_34 = arith.constant 0 : index
    %c0_35 = arith.constant 0 : index
    %48 = vector.load %arg14[%c0_34, %c0_35] : memref<1x128xbf16, #tpu.memory_space<vmem>>, vector<1x128xbf16>
    %49 = arith.extf %48 : vector<1x128xbf16> to vector<1x128xf32>
    %50 = vector.broadcast %49 : vector<1x128xf32> to vector<16x128xf32>
    %51 = arith.addf %47, %50 : vector<16x128xf32>
    %52 = vector.extract_strided_slice %25 {offsets = [0, 0], sizes = [16, 128], strides = [1, 1]} : vector<32x128xf32> to vector<16x128xf32>
    %53 = arith.truncf %52 : vector<16x128xf32> to vector<16x128xbf16>
    %54 = vector.extract_strided_slice %51 {offsets = [0, 0], sizes = [8, 128], strides = [1, 1]} : vector<16x128xf32> to vector<8x128xf32>
    %55 = arith.truncf %54 : vector<8x128xf32> to vector<8x128xbf16>
    %cst_36 = arith.constant dense<0.000000e+00> : vector<8x16xf32>
    %56 = tpu.matmul %55, %53, %cst_36 {dimension_numbers = #tpu.dot_dimension_numbers<[1], [1], [0], [0], [0, 0, 1, 0], [], []>} : vector<8x128xbf16>, vector<16x128xbf16>, vector<8x16xf32> -> vector<8x16xf32>
    %cst_37 = arith.constant dense<0xFF800000> : vector<8xf32>
    %57 = vector.multi_reduction <maximumf>, %56, %cst_37 [1] : vector<8x16xf32> to vector<8xf32>
    %58 = vector.shape_cast %57 : vector<8xf32> to vector<8x1xf32>
    %59 = vector.broadcast %58 : vector<8x1xf32> to vector<8x16xf32>
    %60 = arith.subf %56, %59 : vector<8x16xf32>
    %61 = math.exp %60 : vector<8x16xf32>
    %cst_38 = arith.constant dense<0.000000e+00> : vector<8xf32>
    %62 = vector.multi_reduction <add>, %61, %cst_38 [1] : vector<8x16xf32> to vector<8xf32>
    %63 = vector.shape_cast %62 : vector<8xf32> to vector<8x1xf32>
    %64 = tpu.reciprocal %63 {approx = true} : vector<8x1xf32> -> vector<8x1xf32>
    %65 = vector.broadcast %64 : vector<8x1xf32> to vector<8x16xf32>
    %66 = arith.mulf %61, %65 : vector<8x16xf32>
    %67 = arith.truncf %66 : vector<8x16xf32> to vector<8x16xbf16>
    %c0_39 = arith.constant 0 : index
    %c0_40 = arith.constant 0 : index
    %c0_41 = arith.constant 0 : index
    %68 = vector.load %arg2[%c0_39, %c0_40, %c0_41] : memref<2x16x128xf32, #tpu.memory_space<vmem>>, vector<1x16x128xf32>
    %69 = vector.shape_cast %68 : vector<1x16x128xf32> to vector<16x128xf32>
    %70 = arith.truncf %69 : vector<16x128xf32> to vector<16x128xbf16>
    %cst_42 = arith.constant dense<0.000000e+00> : vector<8x128xf32>
    %71 = tpu.matmul %67, %70, %cst_42 {dimension_numbers = #tpu.dot_dimension_numbers<[1], [0], [0], [1], [0, 0, 1, 1], [], []>} : vector<8x16xbf16>, vector<16x128xbf16>, vector<8x128xf32> -> vector<8x128xf32>
    %c0_43 = arith.constant 0 : index
    %c0_44 = arith.constant 0 : index
    %c0_45 = arith.constant 0 : index
    %72 = vector.load %arg15[%c0_43, %c0_44, %c0_45] : memref<2x8x128xf32, #tpu.memory_space<vmem>>, vector<1x8x128xf32>
    %73 = vector.shape_cast %72 : vector<1x8x128xf32> to vector<8x128xf32>
    %74 = vector.shape_cast %71 : vector<8x128xf32> to vector<1x8x128xf32>
    tpu.vector_store %arg15[%c0_43, %c0_44, %c0_45], %74 {strides = array<i32>} : memref<2x8x128xf32, #tpu.memory_space<vmem>>, vector<1x8x128xf32>,
    %75 = vector.extract_strided_slice %25 {offsets = [16, 0], sizes = [16, 128], strides = [1, 1]} : vector<32x128xf32> to vector<16x128xf32>
    %76 = arith.truncf %75 : vector<16x128xf32> to vector<16x128xbf16>
    %77 = vector.extract_strided_slice %51 {offsets = [8, 0], sizes = [8, 128], strides = [1, 1]} : vector<16x128xf32> to vector<8x128xf32>
    %78 = arith.truncf %77 : vector<8x128xf32> to vector<8x128xbf16>
    %cst_46 = arith.constant dense<0.000000e+00> : vector<8x16xf32>
    %79 = tpu.matmul %78, %76, %cst_46 {dimension_numbers = #tpu.dot_dimension_numbers<[1], [1], [0], [0], [0, 0, 1, 0], [], []>} : vector<8x128xbf16>, vector<16x128xbf16>, vector<8x16xf32> -> vector<8x16xf32>
    %cst_47 = arith.constant dense<0xFF800000> : vector<8xf32>
    %80 = vector.multi_reduction <maximumf>, %79, %cst_47 [1] : vector<8x16xf32> to vector<8xf32>
    %81 = vector.shape_cast %80 : vector<8xf32> to vector<8x1xf32>
    %82 = vector.broadcast %81 : vector<8x1xf32> to vector<8x16xf32>
    %83 = arith.subf %79, %82 : vector<8x16xf32>
    %84 = math.exp %83 : vector<8x16xf32>
    %cst_48 = arith.constant dense<0.000000e+00> : vector<8xf32>
    %85 = vector.multi_reduction <add>, %84, %cst_48 [1] : vector<8x16xf32> to vector<8xf32>
    %86 = vector.shape_cast %85 : vector<8xf32> to vector<8x1xf32>
    %87 = tpu.reciprocal %86 {approx = true} : vector<8x1xf32> -> vector<8x1xf32>
    %88 = vector.broadcast %87 : vector<8x1xf32> to vector<8x16xf32>
    %89 = arith.mulf %84, %88 : vector<8x16xf32>
    %90 = arith.truncf %89 : vector<8x16xf32> to vector<8x16xbf16>
    %c1 = arith.constant 1 : index
    %c0_49 = arith.constant 0 : index
    %c0_50 = arith.constant 0 : index
    %91 = vector.load %arg2[%c1, %c0_49, %c0_50] : memref<2x16x128xf32, #tpu.memory_space<vmem>>, vector<1x16x128xf32>
    %92 = vector.shape_cast %91 : vector<1x16x128xf32> to vector<16x128xf32>
    %93 = arith.truncf %92 : vector<16x128xf32> to vector<16x128xbf16>
    %cst_51 = arith.constant dense<0.000000e+00> : vector<8x128xf32>
    %94 = tpu.matmul %90, %93, %cst_51 {dimension_numbers = #tpu.dot_dimension_numbers<[1], [0], [0], [1], [0, 0, 1, 1], [], []>} : vector<8x16xbf16>, vector<16x128xbf16>, vector<8x128xf32> -> vector<8x128xf32>
    %c1_52 = arith.constant 1 : index
    %c0_53 = arith.constant 0 : index
    %c0_54 = arith.constant 0 : index
    %95 = vector.load %arg15[%c1_52, %c0_53, %c0_54] : memref<2x8x128xf32, #tpu.memory_space<vmem>>, vector<1x8x128xf32>
    %96 = vector.shape_cast %95 : vector<1x8x128xf32> to vector<8x128xf32>
    %97 = vector.shape_cast %94 : vector<8x128xf32> to vector<1x8x128xf32>
    tpu.vector_store %arg15[%c1_52, %c0_53, %c0_54], %97 {strides = array<i32>} : memref<2x8x128xf32, #tpu.memory_space<vmem>>, vector<1x8x128xf32>,
    return
  }
}

</mosaic_0001>

<bundles_post_ra>
// kernel: attention_forward.1
= control target key start
LH: loop header
LB: loop body
LE: loop exit
PB: predicated region body
PF: predicated region fallthrough
CT: control target
= control target key end

     0   :  { %20 = vsyncpa [#allocation3], 0  ;;  %s1107_s0 = inlined_call_operand.vmem [shape: f32[32,4], index: 0, kind: input, shape index: {}]   ;;  %s1108_s1 = inlined_call_operand.vmem [shape: f32[16,4], index: 1, kind: input, shape index: {}]   ;;  %s1109_s2 = inlined_call_operand.vmem [shape: f32[2,16,128], index: 2, kind: input, shape index: {}]   ;;  %s1110_s3 = inlined_call_operand.vmem [shape: bf16[4,128], index: 3, kind: input, shape index: {}]   ;;  %s1111_s4 = inlined_call_operand.vmem [shape: bf16[1,128], index: 4, kind: input, shape index: {}]   ;;  %s1112_s5 = inlined_call_operand.vmem [shape: bf16[128,128], index: 5, kind: input, shape index: {}]   ;;  %s1113_s6 = inlined_call_operand.vmem [shape: bf16[1,128], index: 6, kind: input, shape index: {}]   ;;  %s1114_s7 = inlined_call_operand.hbm [shape: bf16[128,128], index: 7, kind: input, shape index: {}]   ;;  %s1115_s8 = inlined_call_operand.vmem [shape: bf16[1,128], index: 8, kind: input, shape index: {}]   ;;  %s1116_s9 = inlined_call_operand.vmem [shape: bf16[4,128], index: 9, kind: input, shape index: {}]   ;;  %s1117_s10 = inlined_call_operand.vmem [shape: bf16[1,128], index: 10, kind: input, shape index: {}]   ;;  %s1118_s11 = inlined_call_operand.hbm [shape: bf16[128,128], index: 11, kind: input, shape index: {}]   ;;  %s1119_s12 = inlined_call_operand.vmem [shape: bf16[1,128], index: 12, kind: input, shape index: {}]   ;;  %s1120_s13 = inlined_call_operand.hbm [shape: bf16[128,128], index: 13, kind: input, shape index: {}]   ;;  %s1121_s14 = inlined_call_operand.vmem [shape: bf16[1,128], index: 14, kind: input, shape index: {}]   ;;  %s1122_s15 = inlined_call_operand.hbm [shape: f32[2,8,128], index: 15, kind: output, shape index: {}]  }
   0x1   :  { %21 = vsyncpa [#allocation6], 0 }
   0x2   :  { %22 = vsyncpa [#allocation4], 0  ;;  %s60_s20 = sshll.u32 %s1118_s11, 4  ;;  %s920_s21 = smov [#allocation5]   ;;  %s61_s20 = int_to_ptr.hbm [resolvable:$true] %s60_s20 }
   0x3   :  { %s62_s22 = sshll.u32 %s920_s21, 4  ;;  %s41_s25 = sshll.u32 %s1114_s7, 4  ;;  %s63_s22 = int_to_ptr.vmem [resolvable:$true] %s62_s22  ;;  %s42_s25 = int_to_ptr.hbm [resolvable:$true] %s41_s25 }
   0x4   :  { %s921_s26 = smov 64   ;;  %s922_s27 = smov 4  }
   0x5   :  { %68 = dma.hbm_to_vmem [thread:$0]  %s61_s20, 1024, %s63_s22, [#allocation6], %s921_s26, %s921_s26, %s922_s27  }
   0x6   :  { %s923_s28 = smov [#allocation2]   ;;  %s75_s17 = sshll.u32 %s1120_s13, 4  ;;  %s76_s17 = int_to_ptr.hbm [resolvable:$true] %s75_s17 }
   0x7   :  { %s43_s29 = sshll.u32 %s923_s28, 4  ;;  %s924_s11 = smov [#allocation7]   ;;  %s44_s29 = int_to_ptr.vmem [resolvable:$true] %s43_s29 }
   0x8   :  { %49 = dma.hbm_to_vmem [thread:$0]  %s42_s25, 1024, %s44_s29, [#allocation3], %s921_s26, %s921_s26, %s922_s27  }
   0x9   :  { %s77_s18 = sshll.u32 %s924_s11, 4  ;;  %s78_s18 = int_to_ptr.vmem [resolvable:$true] %s77_s18 }
   0xa   :  { %83 = dma.hbm_to_vmem [thread:$0]  %s76_s17, 1024, %s78_s18, [#allocation6], %s921_s26, %s921_s26, %s922_s27  }
   0xb   :  { %914 = dma.done.wait [#allocation3], 1024  }
   0xc   :  { %915 = vsyncadd [#allocation3], 4294966272 }
   0xd   :  { %916 = dma.done.wait [#allocation6], 2048  }
   0xe   :  { %917 = vsyncadd [#allocation6], 4294965248  ;;  %vm116_vm0 = vcmask 1041408   ;;  %v105_v0 = vld [vmem:[%s1110_s3] sm:$0x3]  ;;  %v100_v2 = vld [vmem:[%s1107_s0 + $0x8] sm:$0xff] }
   0xf   :  { %v99_v1 = vld [vmem:[%s1107_s0] sm:$0xff]  ;;  %v118_v3 = vsel %vm116_vm0, %v105_v0, 0  ;;  %v324_v7 = vld [vmem:[%s1108_s1 + $0x8] sm:$0xff]  ;;  %vm109_vm1 = vcmask 31744   ;;  %v777_v10 = vld [vmem:[%s1112_s5 + $0x38] sm:$0xff]  ;;  %vm533_vm2 = vcmask 130048  }
  0x10   :  { %v103_v4 = vpack.c.bf16 %v100_v2, %v99_v1  ;;  %v326_v5 = vld [vmem:[%s1116_s9] sm:$0x3]  ;;  %127 = vmatpush.bf16.msra.mxu0 %v118_v3  ;;  %212 = vmatpush.bf16.msra.mxu1 %v777_v10  ;;  %v776_v11 = vld [vmem:[%s1112_s5 + $0x30] sm:$0xff]  ;;  %v793_v12 = vld [vmem:[#allocation5 + $0x38] sm:$0xff]  ;;  %s621_s22 = sshll.u32 %s1122_s15, 4  ;;  %s926_s23 = smov 128   ;;  %s622_s22 = int_to_ptr.hbm [resolvable:$true] %s621_s22 }
  0x11   :  { %v323_v6 = vld [vmem:[%s1108_s1] sm:$0xff]  ;;  %v334_v8 = vsel %vm116_vm0, %v326_v5, 0  ;;  %v775_v13 = vld [vmem:[%s1112_s5 + $0x28] sm:$0xff]  ;;  %v101_v15 = vld [vmem:[%s1107_s0 + $0x10] sm:$0xff] }
  0x12   :  { %v325_v9 = vpack.c.bf16 %v324_v7, %v323_v6  ;;  %343 = vmatpush.bf16.msra.mxu3 %v334_v8  ;;  %v774_v14 = vld [vmem:[%s1112_s5 + $0x20] sm:$0xff]  ;;  %v102_v16 = vld [vmem:[%s1107_s0 + $0x18] sm:$0xff]  ;;  %v792_v18 = vld [vmem:[#allocation5 + $0x30] sm:$0xff]  ;;  %s927_s0 = smov 8  }
  0x13   :  { %635 = vmatmul.msk.bf16.vlgmr.msra.gmra.mxu0 %vm109_vm1, %v103_v4  ;;  %v104_v17 = vpack.c.bf16 %v102_v16, %v101_v15  ;;  %v791_v19 = vld [vmem:[#allocation5 + $0x28] sm:$0xff]  ;;  %v773_v20 = vld [vmem:[%s1112_s5 + $0x18] sm:$0xff]  ;;  %v790_v21 = vld [vmem:[#allocation5 + $0x20] sm:$0xff] }
  0x14   :  { %420 = vmatpush.bf16.msrb.mxu0 %v793_v12  ;;  %213 = vmatpush.bf16.msra.mxu1 %v776_v11  ;;  %v772_v22 = vld [vmem:[%s1112_s5 + $0x10] sm:$0xff]  ;;  %v789_v23 = vld [vmem:[#allocation5 + $0x18] sm:$0xff]  ;;  %v771_v24 = vld [vmem:[%s1112_s5 + $0x8] sm:$0xff] }
  0x15   :  { %701 = vmatmul.msk.bf16.vlgmr.msra.gmra.mxu3 %vm109_vm1, %v325_v9  ;;  %v788_v25 = vld [vmem:[#allocation5 + $0x10] sm:$0xff]  ;;  %v770_v26 = vld [vmem:[%s1112_s5] sm:$0xff]  ;;  %v787_v27 = vld [vmem:[#allocation5 + $0x8] sm:$0xff] }
  0x16   :  { %v786_v28 = vld [vmem:[#allocation5] sm:$0xff]  ;;  %v785_v31 = vld [vmem:[#allocation2 + $0x38] sm:$0xff]  ;;  %v784_v35 = vld [vmem:[#allocation2 + $0x30] sm:$0xff] }
  0x17   :  { %v106_v29 = vld [vmem:[%s1111_s4] sm:$0x1]  ;;  %v801_v33 = vld [vmem:[#allocation7 + $0x38] sm:$0xff]  ;;  %304 = vmatpush.bf16.msra.mxu2 %v785_v31  ;;  %v783_v38 = vld [vmem:[#allocation2 + $0x28] sm:$0xff] }
  0x18   :  { %214 = vmatpush.bf16.msra.mxu1 %v775_v13  ;;  %421 = vmatpush.bf16.msrb.mxu0 %v792_v18  ;;  %v107_v30 = vunpack.c.l.bf16 %v106_v29  ;;  %v327_v34 = vld [vmem:[%s1117_s10] sm:$0x1]  ;;  %v800_v61 = vld [vmem:[#allocation7 + $0x30] sm:$0xff]  ;;  %v799_v62 = vld [vmem:[#allocation7 + $0x28] sm:$0xff] }
  0x19   :  { %504 = vmatpush.bf16.msrb.mxu3 %v801_v33  ;;  %v328_v37 = vunpack.c.l.bf16 %v327_v34  ;;  %v782_v44 = vld [vmem:[#allocation2 + $0x20] sm:$0xff]  ;;  %v781_v63 = vld [vmem:[#allocation2 + $0x18] sm:$0xff]  ;;  %v780_v1 = vld [vmem:[#allocation2 + $0x10] sm:$0xff] }
  0x1a   :  { %v108_v36 = vperm.slane %v107_v30, 0  ;;  %v798_v0 = vld [vmem:[#allocation7 + $0x20] sm:$0xff]  ;;  %v797_v2 = vld [vmem:[#allocation7 + $0x18] sm:$0xff]  ;;  %v779_v3 = vld [vmem:[#allocation2 + $0x8] sm:$0xff] }
  0x1b   :  { %305 = vmatpush.bf16.msra.mxu2 %v784_v35  ;;  %v329_v42 = vperm.slane %v328_v37, 0  ;;  %v796_v4 = vld [vmem:[#allocation7 + $0x10] sm:$0xff]  ;;  %v778_v5 = vld [vmem:[#allocation2] sm:$0xff]  ;;  %v795_v6 = vld [vmem:[#allocation7 + $0x8] sm:$0xff] }
  0x1c   :  { %215 = vmatpush.bf16.msra.mxu1 %v774_v14  ;;  %422 = vmatpush.bf16.msrb.mxu0 %v791_v19  ;;  %v794_v7 = vld [vmem:[#allocation7] sm:$0xff] }
  0x1d   :  { %505 = vmatpush.bf16.msrb.mxu3 %v800_v61  ;;  %v161_v8 = vld [vmem:[%s1113_s6] sm:$0x1] }
  0x1e   :  { %v162_v9 = vunpack.c.l.bf16 %v161_v8  ;;  %v369_v11 = vld [vmem:[%s1119_s12] sm:$0x1] }
  0x1f   :  { %306 = vmatpush.bf16.msra.mxu2 %v783_v38  ;;  %v370_v13 = vunpack.c.l.bf16 %v369_v11  ;;  %v253_v35 = vld [vmem:[%s1115_s8] sm:$0x1] }
  0x20   :  { %216 = vmatpush.bf16.msra.mxu1 %v773_v20  ;;  %423 = vmatpush.bf16.msrb.mxu0 %v790_v21  ;;  %v163_v12 = vperm.slane %v162_v9, 0  ;;  %v254_v37 = vunpack.c.l.bf16 %v253_v35  ;;  %v453_v38 = vld [vmem:[%s1121_s14] sm:$0x1] }
  0x21   :  { %506 = vmatpush.bf16.msrb.mxu3 %v799_v62  ;;  %v546_v9 = vld [vmem:[%s1109_s2] sm:$0xff] }
  0x23   :  { %636 = vmatmul.msk.bf16.gmra.mxu0 %vm109_vm1, %v104_v17  ;;  %307 = vmatpush.bf16.msra.mxu2 %v782_v44  ;;  %v371_v17 = vperm.slane %v370_v13, 0  ;;  %v768_v13 = vld [vmem:[%s1109_s2 + $0x18] sm:$0xff] }
  0x24   :  { %217 = vmatpush.bf16.msra.mxu1 %v772_v22  ;;  %424 = vmatpush.bf16.msrb.mxu0 %v789_v23 }
  0x25   :  { %507 = vmatpush.bf16.msrb.mxu3 %v798_v0 }
  0x27   :  { %308 = vmatpush.bf16.msra.mxu2 %v781_v63 }
  0x28   :  { %218 = vmatpush.bf16.msra.mxu1 %v771_v24  ;;  %425 = vmatpush.bf16.msrb.mxu0 %v788_v25 }
  0x29   :  { %508 = vmatpush.bf16.msrb.mxu3 %v797_v2 }
  0x2b   :  { %309 = vmatpush.bf16.msra.mxu2 %v780_v1 }
  0x2c   :  { %219 = vmatpush.bf16.msra.mxu1 %v770_v26  ;;  %426 = vmatpush.bf16.msrb.mxu0 %v787_v27 }
  0x2d   :  { %509 = vmatpush.bf16.msrb.mxu3 %v796_v4 }
  0x2f   :  { %310 = vmatpush.bf16.msra.mxu2 %v779_v3 }
  0x30   :  { %427 = vmatpush.bf16.msrb.mxu0 %v786_v28 }
  0x31   :  { %510 = vmatpush.bf16.msrb.mxu3 %v795_v6 }
  0x33   :  { %311 = vmatpush.bf16.msra.mxu2 %v778_v5 }
  0x35   :  { %511 = vmatpush.bf16.msrb.mxu3 %v794_v7 }
  0x90   :  { %v129_v32 = vpop.f32.mrf.mxu0 }
  0x91   :  { %v130_v39 = vadd.f32 %v129_v32, %v108_v36 }
  0x93   :  { %v139_v45 = vmax.f32 %v130_v39, 0.0  ;;  %v255_v39 = vperm.slane %v254_v37, 0 }
  0x98   :  { %v345_v40 = vpop.f32.mrf.mxu3  ;;  %v131_v41 = vpop.f32.mrf.mxu0 }
  0x99   :  { %v132_v43 = vadd.f32 %v131_v41, %v108_v36  ;;  %v346_v47 = vadd.f32 %v345_v40, %v329_v42  ;;  %v454_v40 = vunpack.c.l.bf16 %v453_v38 }
  0x9b   :  { %v140_v46 = vmax.f32 %v132_v43, 0.0  ;;  %v350_v50 = vmax.f32 %v346_v47, 0.0  ;;  %v455_v44 = vperm.slane %v454_v40, 0 }
  0x9d   :  { %v143_v48 = vpack.c.bf16 %v140_v46, %v139_v45 }
  0x9f   :  { %220 = vmatmul.bf16.vlgmr.msra.gmra.mxu1 %v143_v48 }
  0xa0   :  { %v347_v49 = vpop.f32.mrf.mxu3  ;;  %v134_v51 = vpop.f32.mrf.mxu0 }
  0xa1   :  { %v348_v52 = vadd.f32 %v347_v49, %v329_v42  ;;  %v135_v55 = vadd.f32 %v134_v51, %v108_v36 }
  0xa3   :  { %v351_v53 = vmax.f32 %v348_v52, 0.0  ;;  %v141_v58 = vmax.f32 %v135_v55, 0.0 }
  0xa5   :  { %v352_v54 = vpack.c.bf16 %v351_v53, %v350_v50 }
  0xa7   :  { %428 = vmatmul.bf16.vlgmr.msrb.gmra.mxu0 %v352_v54 }
  0xa8   :  { %v136_v56 = vpop.f32.mrf.mxu0 }
  0xa9   :  { %v137_v57 = vadd.f32 %v136_v56, %v108_v36 }
  0xab   :  { %v142_v59 = vmax.f32 %v137_v57, 0.0 }
  0xad   :  { %v144_v60 = vpack.c.bf16 %v142_v59, %v141_v58 }
  0xaf   :  { %225 = vmatmul.bf16.gmra.mxu1 %v144_v60 }
 0x11c   :  { %v221_v10 = vpop.f32.mrf.mxu1 }
 0x11d   :  { %v222_v14 = vadd.f32 %v221_v10, %v163_v12  ;;  %v547_v10 = vld [vmem:[%s1109_s2 + $0x8] sm:$0xff] }
 0x11e   :  { %v548_v11 = vpack.c.bf16 %v547_v10, %v546_v9 }
 0x11f   :  { %v231_v19 = vmax.f32 %v222_v14, 0.0 }
 0x120   :  { %559 = vmatpush.bf16.msra.mxu3 %v548_v11 }
 0x124   :  { %v429_v15 = vpop.f32.mrf.mxu0  ;;  %v223_v16 = vpop.f32.mrf.mxu1 }
 0x125   :  { %v224_v18 = vadd.f32 %v223_v16, %v163_v12  ;;  %v430_v21 = vadd.f32 %v429_v15, %v371_v17 }
 0x127   :  { %v232_v20 = vmax.f32 %v224_v18, 0.0  ;;  %v434_v24 = vmax.f32 %v430_v21, 0.0 }
 0x129   :  { %v235_v22 = vpack.c.bf16 %v232_v20, %v231_v19 }
 0x12b   :  { %312 = vmatmul.bf16.vlgmr.msra.gmra.mxu2 %v235_v22 }
 0x12c   :  { %v431_v23 = vpop.f32.mrf.mxu0  ;;  %v226_v25 = vpop.f32.mrf.mxu1 }
 0x12d   :  { %v432_v26 = vadd.f32 %v431_v23, %v371_v17  ;;  %v227_v29 = vadd.f32 %v226_v25, %v163_v12 }
 0x12f   :  { %v435_v27 = vmax.f32 %v432_v26, 0.0  ;;  %v233_v32 = vmax.f32 %v227_v29, 0.0 }
 0x131   :  { %v436_v28 = vpack.c.bf16 %v435_v27, %v434_v24 }
 0x133   :  { %512 = vmatmul.bf16.vlgmr.msrb.gmra.mxu3 %v436_v28 }
 0x134   :  { %v228_v30 = vpop.f32.mrf.mxu1 }
 0x135   :  { %v229_v31 = vadd.f32 %v228_v30, %v163_v12  ;;  %v767_v12 = vld [vmem:[%s1109_s2 + $0x10] sm:$0xff]  ;;  %s925_s2 = smov [#allocation8]  }
 0x136   :  { %v596_v14 = vpack.c.bf16 %v768_v13, %v767_v12  ;;  %s619_s20 = sshll.u32 %s925_s2, 4  ;;  %s620_s20 = int_to_ptr.vmem [resolvable:$true] %s619_s20 }
 0x137   :  { %v234_v33 = vmax.f32 %v229_v31, 0.0 }
 0x138   :  { %607 = vmatpush.bf16.msrb.mxu2 %v596_v14 }
 0x139   :  { %v236_v34 = vpack.c.bf16 %v234_v33, %v233_v32 }
 0x13b   :  { %317 = vmatmul.bf16.gmra.mxu2 %v236_v34 }
 0x1ae   :  { %v313_v36 = vpop.f32.mrf.mxu2 }
 0x1af   :  { %v314_v42 = vadd.f32 %v313_v36, %v255_v39 }
 0x1b6   :  { %v315_v41 = vpop.f32.mrf.mxu2  ;;  %v513_v46 = vpop.f32.mrf.mxu3 }
 0x1b7   :  { %v316_v43 = vadd.f32 %v315_v41, %v255_v39  ;;  %v514_v47 = vadd.f32 %v513_v46, %v455_v44 }
 0x1b9   :  { %v518_v45 = vpack.c.bf16 %v316_v43, %v314_v42  ;;  %v519_v49 = vpack.c.bf16 %v514_v47, %v514_v47 }
 0x1bb   :  { %527 = vmatpush.bf16.xpose.msra.mxu0 %v518_v45 }
 0x1be   :  { %v318_v48 = vpop.f32.mrf.mxu2  ;;  %v515_v54 = vpop.f32.mrf.mxu3 }
 0x1bf   :  { %v319_v51 = vadd.f32 %v318_v48, %v255_v39  ;;  %v516_v55 = vadd.f32 %v515_v54, %v455_v44 }
 0x1c1   :  { %v567_v56 = vpack.c.bf16 %v516_v55, %v516_v55 }
 0x1c2   :  { %528 = vmatmul.bf16.vlgmr.msra.gmra.mxu0 %v519_v49 }
 0x1c6   :  { %v320_v50 = vpop.f32.mrf.mxu2 }
 0x1c7   :  { %v321_v52 = vadd.f32 %v320_v50, %v255_v39 }
 0x1c9   :  { %v566_v53 = vpack.c.bf16 %v321_v52, %v319_v51 }
 0x1cb   :  { %575 = vmatpush.bf16.xpose.msrb.mxu1 %v566_v53 }
 0x1d2   :  { %576 = vmatmul.bf16.vlgmr.msrb.gmra.mxu1 %v567_v56 }
 0x23f   :  { %v529_v57 = vpop.f32.mrf.mxu0 }
 0x240   :  { %v534_v58 = vsel %vm533_vm2, %v529_v57, -inf }
 0x241   :  { %535 = vmax.xlane.f32.xlu0 %v534_v58 }
 0x247   :  { %v531_v59 = vpop.f32.mrf.mxu0 }
 0x24f   :  { %v577_v60 = vpop.f32.mrf.mxu1 }
 0x250   :  { %v581_v61 = vsel %vm533_vm2, %v577_v60, -inf }
 0x251   :  { %582 = vmax.xlane.f32.xlu0 %v581_v61 }
 0x257   :  { %v579_v62 = vpop.f32.mrf.mxu1 }
 0x2b4   :  { %v536_v63 = vpop.xlane.xlu0 %535 }
 0x2b5   :  { %v537_v0 = vsub.f32 %v529_v57, %v536_v63 }
 0x2b7   :  { %v538_v1 = vmul.f32 1.442695, %v537_v0 }
 0x2b9   :  { %810 = vpow2.f32 %v538_v1 }
 0x2bf   :  { %v811_v2 = vpop.eup %810 }
 0x2c0   :  { %v540_v3 = vsel %vm533_vm2, %v811_v2, 0.0 }
 0x2c1   :  { %541 = vadd.xlane.f32.xlu1 %v540_v3 }
 0x2c4   :  { %v583_v4 = vpop.xlane.xlu0 %582 }
 0x2c5   :  { %v584_v5 = vsub.f32 %v577_v60, %v583_v4 }
 0x2c7   :  { %v585_v6 = vmul.f32 1.442695, %v584_v5 }
 0x2c9   :  { %812 = vpow2.f32 %v585_v6 }
 0x2cf   :  { %v813_v7 = vpop.eup %812 }
 0x2d0   :  { %v587_v8 = vsel %vm533_vm2, %v813_v7, 0.0 }
 0x2d1   :  { %588 = vadd.xlane.f32.xlu1 %v587_v8 }
 0x334   :  { %v542_v15 = vpop.xlane.xlu1 %541 }
 0x335   :  { %814 = vrcp.f32 %v542_v15 }
 0x33b   :  { %v815_v16 = vpop.eup %814 }
 0x33c   :  { %v544_v17 = vmul.f32 %v815_v16, %v811_v2 }
 0x33e   :  { %v545_v18 = vpack.c.bf16 %v544_v17, %v544_v17 }
 0x340   :  { %766 = vmatmul.msk.bf16.vlgmr.msra.gmra.mxu3 %vm533_vm2, %v545_v18 }
 0x344   :  { %v589_v19 = vpop.xlane.xlu1 %588 }
 0x345   :  { %816 = vrcp.f32 %v589_v19 }
 0x34b   :  { %v817_v20 = vpop.eup %816 }
 0x34c   :  { %v591_v21 = vmul.f32 %v817_v20, %v813_v7 }
 0x34e   :  { %v592_v22 = vpack.c.bf16 %v591_v21, %v591_v21 }
 0x350   :  { %769 = vmatmul.msk.bf16.vlgmr.msrb.gmra.mxu2 %vm533_vm2, %v592_v22 }
 0x3c3   :  { %v561_v23 = vpop.f32.mrf.mxu3 }
 0x3c4   :  { %565 = vst [vmem:[#allocation8] sm:$0xff] %v561_v23 }
 0x3cb   :  { %v563_v24 = vpop.f32.mrf.mxu3 }
 0x3d3   :  { %v609_v25 = vpop.f32.mrf.mxu2 }
 0x3d4   :  { %614 = vst [vmem:[#allocation8 + $0x8] sm:$0xff] %v609_v25 }
 0x3d5   :  { %627 = dma.vmem_to_hbm [thread:$0]  %s620_s20, 256, %s622_s22, [#allocation4], %s926_s23, %s926_s23, %s927_s0  }
 0x3db   :  { %v611_v26 = vpop.f32.mrf.mxu2 }
 0x3dc   :  { %918 = dma.done.wait [#allocation4], 256  }
 0x3dd   :  { %919 = vsyncadd [#allocation4], 4294967040 }
 0x3de   :  { %632 = vsyncpa [#allocation3], 1 }
 0x3df   :  { %633 = vsyncpa [#allocation6], 1 }
 0x3e0   :  { %634 = vsyncpa [#allocation4], 1 }

</bundles_post_ra>
